<compile_context>
chip_gen: v6e
topology: v6e:2x2x1
jax: 0.10.0
libtpu: 0.0.40
codegen_flags: <defaults>
</compile_context>

<pallas_src>
import jax
import jax.numpy as jnp
from jax import lax
from jax.experimental import pallas as pl
from jax.experimental.pallas import tpu as pltpu


def _round_up(v, m):
    return (v + m - 1) // m * m


def _linear_kernel(x_ref, w_ref, b_ref, o_ref, acc_ref):
    # x_ref:   (tm, tk)  activations tile
    # w_ref:   (tn, tk)  weight tile in PyTorch (out, in) layout
    # b_ref:   (1,  tn)  bias tile (independent of the K axis)
    # o_ref:   (tm, tn)  output tile
    # acc_ref: (tm, tn)  f32 accumulator scratch
    k = pl.program_id(2)

    @pl.when(k == 0)
    def _init():
        # Fold the bias into the accumulator init (no separate add later).
        acc_ref[...] = jnp.broadcast_to(
            b_ref[...].astype(jnp.float32), acc_ref.shape)

    # Contract over the shared K dimension (dim 1 of both operands) so the
    # weight is consumed in its native (out, in) layout.
    acc_ref[...] += lax.dot_general(
        x_ref[...], w_ref[...],
        dimension_numbers=(((1,), (1,)), ((), ())),
        preferred_element_type=jnp.float32)

    @pl.when(k == pl.num_programs(2) - 1)
    def _finalize():
        o_ref[...] = acc_ref[...].astype(o_ref.dtype)


def fully_connect_layer(x, weight, bias, *, tm_max=256, tn_max=1024, tk_max=512):
    """Pallas implementation of FullyConnectLayer.forward.

    x      : (B, ...) arbitrary trailing dims, flattened to (B, K)
    weight : (out_channels, K)   -- PyTorch nn.Linear convention
    bias   : (out_channels,)
    returns: (B, out_channels)
    """
    B = x.shape[0]
    K = 1
    for d in x.shape[1:]:
        K *= d
    N = weight.shape[0]

    x2d = x.reshape(B, K)   # matches torch x.view(-1, flattenNum)

    # Tile sizes. Double-buffered working set at the defaults:
    #   w: 2*1024*512*4 = 4 MiB, x: 2*256*512*4 = 1 MiB,
    #   out: 2*256*1024*4 = 2 MiB, acc: 1 MiB  -> ~8 MiB, safe on v5e/v6e/v7x.
    tm = min(_round_up(B, 8), tm_max)
    tn = min(_round_up(N, 128), tn_max)
    tk = min(_round_up(K, 128), tk_max)
    Mp = _round_up(B, tm)
    Np = _round_up(N, tn)
    Kp = _round_up(K, tk)

    # Pad only when needed (padded K columns contribute 0 to the accumulator;
    # padded M rows / N columns are sliced off below).
    x_p = x2d
    if (Mp, Kp) != (B, K):
        x_p = jnp.pad(x2d, ((0, Mp - B), (0, Kp - K)))
    w_p = weight
    if (Np, Kp) != (N, K):
        w_p = jnp.pad(weight, ((0, Np - N), (0, Kp - K)))
    b_p = bias if Np == N else jnp.pad(bias, (0, Np - N))
    b_p = b_p.reshape(1, Np)

    grid = (Mp // tm, Np // tn, Kp // tk)

    itemsize = jnp.dtype(x.dtype).itemsize
    cost = pl.CostEstimate(
        flops=2 * B * K * N,
        transcendentals=0,
        bytes_accessed=int((Np * Kp + Mp * Kp + Mp * Np + Np) * itemsize),
    )

    out = pl.pallas_call(
        _linear_kernel,
        out_shape=jax.ShapeDtypeStruct((Mp, Np), x.dtype),
        grid_spec=pltpu.PrefetchScalarGridSpec(
            num_scalar_prefetch=0,
            grid=grid,
            in_specs=[
                pl.BlockSpec((tm, tk), lambda i, j, k: (i, k)),   # activations
                pl.BlockSpec((tn, tk), lambda i, j, k: (j, k)),   # weight (out, in)
                pl.BlockSpec((1, tn), lambda i, j, k: (0, j)),    # bias, K-independent
            ],
            out_specs=pl.BlockSpec((tm, tn), lambda i, j, k: (i, j)),
            scratch_shapes=[pltpu.VMEM((tm, tn), jnp.float32)],
        ),
        compiler_params=pltpu.CompilerParams(
            dimension_semantics=("parallel", "parallel", "arbitrary"),
            vmem_limit_bytes=32 * 1024 * 1024,
        ),
        cost_estimate=cost,
    )(x_p, w_p, b_p)

    return out[:B, :N]


if __name__ == "__main__":
    key = jax.random.PRNGKey(0)
    kx, kw, kb = jax.random.split(key, 3)

    # Small shapes: batch=2, channels=4, spatial=16x16 -> in_features = 1024
    # (exercises the K-reduction grid axis: 1024 / tk(512) = 2 steps).
    B, C, H, W = 2, 4, 16, 16
    in_channels = C * H * W
    out_channels = 32

    x = jax.random.normal(kx, (B, C, H, W), dtype=jnp.float32)
    # Deterministic synthetic parameters (nn.Linear shapes: (out, in) and (out,))
    bound = 1.0 / (in_channels ** 0.5)
    weight = jax.random.uniform(kw, (out_channels, in_channels),
                                minval=-bound, maxval=bound, dtype=jnp.float32)
    bias = jax.random.uniform(kb, (out_channels,),
                              minval=-bound, maxval=bound, dtype=jnp.float32)

    y = fully_connect_layer(x, weight, bias)
    y = jax.block_until_ready(y)

    # Reference check against plain JAX
    y_ref = x.reshape(B, -1) @ weight.T + bias
    assert y.shape == (B, out_channels)
    assert jnp.allclose(y, y_ref, atol=1e-4, rtol=1e-4)

    print("KERNEL_OK")
</pallas_src>

<mosaic_0001>
module attributes {stable_mosaic.version = 11 : i64} {
  func.func @_linear_kernel(%arg0: i32, %arg1: i32, %arg2: i32, %arg3: memref<8x512xf32, #tpu.memory_space<vmem>>, %arg4: memref<128x512xf32, #tpu.memory_space<vmem>>, %arg5: memref<1x128xf32, #tpu.memory_space<vmem>>, %arg6: memref<8x128xf32, #tpu.memory_space<vmem>>, %arg7: memref<8x128xf32, #tpu.memory_space<vmem>>) attributes {dimension_semantics = [#tpu.dimension_semantics<parallel>, #tpu.dimension_semantics<parallel>, #tpu.dimension_semantics<arbitrary>], iteration_bounds = array<i64: 1, 1, 2>, scalar_prefetch = 0 : i64, scratch_operands = 1 : i64, tpu.core_type = #tpu.core_type<tc>, window_params = [{transform_indices = @transform_0, window_bounds = array<i64: 8, 512>}, {transform_indices = @transform_1, window_bounds = array<i64: 128, 512>}, {transform_indices = @transform_2, window_bounds = array<i64: 1, 128>}, {transform_indices = @transform_3, window_bounds = array<i64: 8, 128>}]} {
    %c0_i32 = arith.constant 0 : i32
    %0 = arith.cmpi eq, %arg2, %c0_i32 : i32
    %1 = arith.extui %0 : i1 to i32
    %c0_i32_0 = arith.constant 0 : i32
    %2 = arith.cmpi ne, %1, %c0_i32_0 : i32
    scf.if %2 {
      %c0_9 = arith.constant 0 : index
      %c0_10 = arith.constant 0 : index
      %12 = vector.load %arg5[%c0_9, %c0_10] : memref<1x128xf32, #tpu.memory_space<vmem>>, vector<1x128xf32>
      %13 = vector.shape_cast %12 : vector<1x128xf32> to vector<1x128xf32>
      %14 = vector.broadcast %13 : vector<1x128xf32> to vector<8x128xf32>
      %c0_11 = arith.constant 0 : index
      %c0_12 = arith.constant 0 : index
      %15 = vector.load %arg7[%c0_11, %c0_12] : memref<8x128xf32, #tpu.memory_space<vmem>>, vector<8x128xf32>
      tpu.vector_store %arg7[%c0_11, %c0_12], %14 {strides = array<i32>} : memref<8x128xf32, #tpu.memory_space<vmem>>, vector<8x128xf32>,
    } else {
    }
    %c0 = arith.constant 0 : index
    %c0_1 = arith.constant 0 : index
    %3 = vector.load %arg7[%c0, %c0_1] : memref<8x128xf32, #tpu.memory_space<vmem>>, vector<8x128xf32>
    %c0_2 = arith.constant 0 : index
    %c0_3 = arith.constant 0 : index
    %4 = vector.load %arg3[%c0_2, %c0_3] : memref<8x512xf32, #tpu.memory_space<vmem>>, vector<8x512xf32>
    %c0_4 = arith.constant 0 : index
    %c0_5 = arith.constant 0 : index
    %5 = vector.load %arg4[%c0_4, %c0_5] : memref<128x512xf32, #tpu.memory_space<vmem>>, vector<128x512xf32>
    %cst = arith.constant dense<0.000000e+00> : vector<8x128xf32>
    %6 = tpu.matmul %4, %5, %cst {dimension_numbers = #tpu.dot_dimension_numbers<[1], [1], [0], [0], [0, 0, 1, 0], [], []>} : vector<8x512xf32>, vector<128x512xf32>, vector<8x128xf32> -> vector<8x128xf32>
    %7 = arith.addf %3, %6 : vector<8x128xf32>
    %c0_6 = arith.constant 0 : index
    %c0_7 = arith.constant 0 : index
    %8 = vector.load %arg7[%c0_6, %c0_7] : memref<8x128xf32, #tpu.memory_space<vmem>>, vector<8x128xf32>
    tpu.vector_store %arg7[%c0_6, %c0_7], %7 {strides = array<i32>} : memref<8x128xf32, #tpu.memory_space<vmem>>, vector<8x128xf32>,
    %c1_i32 = arith.constant 1 : i32
    %9 = arith.cmpi eq, %arg2, %c1_i32 : i32
    %10 = arith.extui %9 : i1 to i32
    %c0_i32_8 = arith.constant 0 : i32
    %11 = arith.cmpi ne, %10, %c0_i32_8 : i32
    scf.if %11 {
      %c0_9 = arith.constant 0 : index
      %c0_10 = arith.constant 0 : index
      %12 = vector.load %arg7[%c0_9, %c0_10] : memref<8x128xf32, #tpu.memory_space<vmem>>, vector<8x128xf32>
      %c0_11 = arith.constant 0 : index
      %c0_12 = arith.constant 0 : index
      %13 = vector.load %arg6[%c0_11, %c0_12] : memref<8x128xf32, #tpu.memory_space<vmem>>, vector<8x128xf32>
      tpu.vector_store %arg6[%c0_11, %c0_12], %12 {strides = array<i32>} : memref<8x128xf32, #tpu.memory_space<vmem>>, vector<8x128xf32>,
    } else {
    }
    return
  }
  func.func @transform_0(%arg0: i32, %arg1: i32, %arg2: i32) -> (i32, i32) {
    %c0_i32 = arith.constant 0 : i32
    return %arg0, %arg2 : i32, i32
  }
  func.func @transform_1(%arg0: i32, %arg1: i32, %arg2: i32) -> (i32, i32) {
    %c0_i32 = arith.constant 0 : i32
    return %arg1, %arg2 : i32, i32
  }
  func.func @transform_2(%arg0: i32, %arg1: i32, %arg2: i32) -> (i32, i32) {
    %c0_i32 = arith.constant 0 : i32
    %c0_i32_0 = arith.constant 0 : i32
    return %c0_i32, %arg1 : i32, i32
  }
  func.func @transform_3(%arg0: i32, %arg1: i32, %arg2: i32) -> (i32, i32) {
    %c0_i32 = arith.constant 0 : i32
    return %arg0, %arg1 : i32, i32
  }
}

</mosaic_0001>

<bundles_post_ra>
// kernel: tpu_custom_call.1
= control target key start
LH: loop header
LB: loop body
LE: loop exit
PB: predicated region body
PF: predicated region fallthrough
CT: control target
= control target key end

     0   :  { %8 = vsyncpa [#allocation4], 0  ;;  %s1084_s0 = inlined_call_operand.hbm [shape: f32[8,1024], index: 0, kind: input, shape index: {}]   ;;  %s1085_s1 = inlined_call_operand.hbm [shape: f32[128,1024], index: 1, kind: input, shape index: {}]   ;;  %s1086_s2 = inlined_call_operand.vmem [shape: f32[1,128], index: 2, kind: input, shape index: {}]   ;;  %s1087_s3 = inlined_call_operand.hbm [shape: f32[8,128], index: 3, kind: output, shape index: {}]  }
   0x1   :  { %10 = vsyncpa [#allocation4 + $0x1], 0 }
   0x2   :  { %11 = vsyncpa [#allocation7], 0 }
   0x3   :  { %13 = vsyncpa [#allocation7 + $0x1], 0 }
   0x4   :  { %14 = vsyncpa [#allocation5], 0  ;;  %s870_s12 = smov 0   ;;  %s872_s13 = smov 0  }
   0x5   :  { %s874_s14 = smov 0   ;;  %s876_s15 = smov 0  }
   0x6   :  { %s878_s16 = smov 0   ;;  %s880_s17 = smov 0  }
   0x7 LB: > { %s612_s18 = sadd.s32 4294967295, %s842_s17   ;;  %s32_s19 = sadd.s32 1, %s838_s16  ;;  %s842_s17 = sphi %s880_s17, %s20_s17   ;;  %s838_s16 = sphi %s878_s16, %s1097_s16   ;;  %s834_s15 = sphi %s876_s15, %s1096_s15   ;;  %s830_s14 = sphi %s874_s14, %s1095_s14   ;;  %s826_s13 = sphi %s872_s13, %s1094_s13   ;;  %s822_s12 = sphi %s870_s12, %s1093_s12  }
   0x8   : > { %p33_p0 = scmp.ge.s32.totalorder %s32_s19, 2  ;;  %s48_s20 = sadd.s32 1, %s830_s14 }
   0x9   : > { %p55_p1 = scmp.ne.s32.totalorder %s830_s14, %s826_s13  ;;  %p56_p2 = scmp.eq.s32.totalorder %s842_s17, 0 }
   0xa   : > { %s1099_s19 = smov (%p33_p0, %s32_s19), 0  ;;  %p61_p4 = scmp.ne.s32.totalorder %s826_s13, %s822_s12 }
   0xb   : > { %p906_p3 = por %p56_p2, %p55_p1  ;;  %s44_s22 = ssub.s32 %s838_s16, %s1099_s19 }
   0xc   : > { %p62_p5 = scmp.eq.s32.totalorder %s612_s18, 0  ;;  %p46_p6 = scmp.eq.s32.totalorder %s44_s22, 0 }
   0xd   : > { %p649_p8 = scmp.lt.s32.totalorder %s842_s17, 2  ;;  %s924_s25 = sand.u32 1, %s830_s14  }
   0xe   : > { %p915_p7 = por %p62_p5, %p61_p4  ;;  %s632_s26 = sshll.u32 %s838_s16, 9 }
   0xf   : > { %s921_s24 = scalar_select %p46_p6, %s830_s14, %s48_s20  }
  0x10   : > { %s616_s27 = sshll.u32 %s924_s25, 5  ;;  %s185_s30 = scalar_lea.hbm %s1084_s0, %s632_s26 }
  0x11   : > { %s177_s4 = scalar_lea.vmem [#allocation3], %s616_s27  ;;  %p933_p9 = pnand %p649_p8, %p906_p3 }
  0x12   : > { %s187_s5 = sshll.u32 %s177_s4, 4  ;;  %s619_s7 = sshll.u32 %s924_s25, 9  ;;  %s188_s5 = int_to_ptr.vmem [resolvable:$true] %s187_s5 }
  0x13   : > { %s174_s8 = scalar_lea.sflag [#allocation4], %s924_s25  ;;  %p706_p10 = pneg %p933_p9 }
  0x14   : > { %s717_s9 = scalar_lea.vmem %s188_s5, 512  ;;  %s844_s10 = smov [#allocation3]  }
  0x15   : > { %p718_p11 = scmp.ne.s32.totalorder %s188_s5, %s717_s9  ;;  %s722_s11 = sshll.u32 %s844_s10, 4  ;;  %s723_s11 = int_to_ptr.vmem [resolvable:$false] %s722_s11 }
  0x16   : > { %s724_s12 = scalar_lea.vmem %s723_s11, 1024  ;;  %p725_p0 = scmp.lt.s32.totalorder %s188_s5, %s723_s11 }
  0x17   : > { %p720_p12 = pnand %p718_p11, %p706_p10  ;;  %p726_p1 = scmp.lt.s32.totalorder %s724_s12, %s717_s9 }
  0x19   : > { %p721_p13 = pneg %p720_p12  ;;  %p727_p2 = por %p726_p1, %p725_p0 }
  0x1b   : > { %p728_p3 = pnand %p727_p2, %p721_p13 }
  0x1d   : > { %731 = shalt.err (!%p728_p3)
}
  0x1e   : > { %645 = dma.hbm_to_vmem [thread:$0]  (!%p933_p9), %s185_s30, 512, %s188_s5, %s174_s8  }
  0x1f   : > { %s207_s22 = scalar_lea.hbm %s1085_s1, %s632_s26  ;;  %p622_p4 = scmp.ge.s32.totalorder %s842_s17, 1 }
  0x20   : > { %p216_p5 = scmp.lt.s32.totalorder %s842_s17, 3  ;;  %s198_s27 = scalar_lea.vmem [#allocation6], %s619_s7 }
  0x21   : > { %s208_s28 = sshll.u32 %s198_s27, 4  ;;  %s195_s4 = scalar_lea.sflag [#allocation7], %s924_s25  ;;  %s209_s28 = int_to_ptr.vmem [resolvable:$true] %s208_s28 }
  0x22   : > { %p951_p6 = pnand %p622_p4, %p216_p5  ;;  %s745_s9 = scalar_lea.vmem %s209_s28, 8192 }
  0x23   : > { %p746_p8 = scmp.ne.s32.totalorder %s209_s28, %s745_s9  ;;  %s845_s30 = smov [#allocation6]  }
  0x24   : > { %s750_s5 = sshll.u32 %s845_s30, 4  ;;  %s751_s5 = int_to_ptr.vmem [resolvable:$false] %s750_s5 }
  0x25   : > { %p748_p11 = pnand %p746_p8, %p706_p10  ;;  %s752_s26 = scalar_lea.vmem %s751_s5, 16384 }
  0x26   : > { %p753_p13 = scmp.lt.s32.totalorder %s209_s28, %s751_s5  ;;  %p754_p0 = scmp.lt.s32.totalorder %s752_s26, %s745_s9 }
  0x27   : > { %p749_p12 = pneg %p748_p11 }
  0x28   : > { %p755_p1 = por %p754_p0, %p753_p13 }
  0x2a   : > { %p756_p2 = pnand %p755_p1, %p749_p12 }
  0x2c   : > { %759 = shalt.err (!%p756_p2)
}
  0x2d   : > { %s846_s7 = smov 1024   ;;  %s847_s8 = smov 512  }
  0x2e   : > { %s848_s10 = smov 32   ;;  %220 = sbr.rel (%p951_p6) target bundleno = 350 (0x15e), region = 32 }
  0x2f   : > { %648 = dma.hbm_to_vmem [thread:$0]  (!%p933_p9), %s207_s22, 8192, %s209_s28, %s195_s4, %s846_s7, %s847_s8, %s848_s10  }
  0x30   : > { %s222_s25 = sand.u32 (!%p951_p6), 1, %s826_s13  }
  0x31   : > { %s623_s11 = sshll.u32 (!%p951_p6), %s222_s25, 5  ;;  %s223_s12 = scalar_lea.sflag (!%p951_p6), [#allocation4], %s222_s25 }
  0x32   : > { %s964_s20 = scalar_lea.vmem (!%p951_p6), [#allocation3], %s623_s11 }
  0x33   : > { %809 = dma.done.wait (%p915_p7), %s223_s12, 512  }
  0x34   : > { %811 = vsyncadd (%p915_p7), %s223_s12, 4294966784  ;;  %s624_s21 = sshll.u32 %s222_s25, 9  ;;  %s232_s27 = scalar_lea.sflag [#allocation7], %s222_s25 }
  0x35   : > { %s970_s6 = scalar_lea.vmem [#allocation6], %s624_s21 }
  0x36   : > { %813 = dma.done.wait (%p915_p7), %s232_s27, 8192  }
  0x37   : > { %815 = vsyncadd (%p915_p7), %s232_s27, 4294959104  ;;  %p625_p9 = scmp.ne.s32.totalorder %s834_s15, 0 }
  0x39   : > { %270 = sbr.rel (%p625_p9) target bundleno = 64 (0x40), region = 44 }
  0x3e   : > { %v626_v0 = vld [vmem:[%s1086_s2] ss:$0 sm:$0xff] }
  0x3f   : > { %278 = vst [vmem:[#allocation2] sm:$0xff] %v626_v0 }
  0x40 PF: > { %v345_v1 = vld [vmem:[%s970_s6 + $0x1e8] sm:$0xff]  ;;  %v347_v2 = vld [vmem:[%s970_s6 + $0x1f8] sm:$0xff]  ;;  %v344_v3 = vld [vmem:[%s970_s6 + $0x1e0] sm:$0xff]  ;;  %p627_p7 = scmp.ne.s32.totalorder %s834_s15, 1 }
  0x41   : > { %348 = vmatprep.subr.mxu0 %v345_v1  ;;  %418 = vmatprep.subr.mxu1 %v347_v2  ;;  %v346_v4 = vld [vmem:[%s970_s6 + $0x1f0] sm:$0xff]  ;;  %v341_v5 = vld [vmem:[%s970_s6 + $0x1c8] sm:$0xff]  ;;  %v343_v6 = vld [vmem:[%s970_s6 + $0x1d8] sm:$0xff] }
  0x42   : > { %349 = vmatpush1.xpose.msra.mxu0 %v344_v3  ;;  %419 = vmatpush1.xpose.msra.mxu1 %v346_v4  ;;  %v340_v7 = vld [vmem:[%s970_s6 + $0x1c0] sm:$0xff]  ;;  %v342_v8 = vld [vmem:[%s970_s6 + $0x1d0] sm:$0xff]  ;;  %v337_v9 = vld [vmem:[%s970_s6 + $0x1a8] sm:$0xff] }
  0x43   : > { %350 = vmatprep.subr.mxu0 %v341_v5  ;;  %420 = vmatprep.subr.mxu1 %v343_v6  ;;  %v339_v10 = vld [vmem:[%s970_s6 + $0x1b8] sm:$0xff]  ;;  %v336_v11 = vld [vmem:[%s970_s6 + $0x1a0] sm:$0xff]  ;;  %v338_v12 = vld [vmem:[%s970_s6 + $0x1b0] sm:$0xff] }
  0x44   : > { %v333_v13 = vld [vmem:[%s970_s6 + $0x188] sm:$0xff]  ;;  %v335_v14 = vld [vmem:[%s970_s6 + $0x198] sm:$0xff]  ;;  %v332_v15 = vld [vmem:[%s970_s6 + $0x180] sm:$0xff] }
  0x45   : > { %v334_v16 = vld [vmem:[%s970_s6 + $0x190] sm:$0xff]  ;;  %v329_v17 = vld [vmem:[%s970_s6 + $0x168] sm:$0xff]  ;;  %v331_v18 = vld [vmem:[%s970_s6 + $0x178] sm:$0xff] }
  0x46   : > { %351 = vmatpush1.xpose.msra.mxu0 %v340_v7  ;;  %421 = vmatpush1.xpose.msra.mxu1 %v342_v8  ;;  %v328_v19 = vld [vmem:[%s970_s6 + $0x160] sm:$0xff]  ;;  %v330_v20 = vld [vmem:[%s970_s6 + $0x170] sm:$0xff]  ;;  %v325_v21 = vld [vmem:[%s970_s6 + $0x148] sm:$0xff] }
  0x47   : > { %352 = vmatprep.subr.mxu0 %v337_v9  ;;  %422 = vmatprep.subr.mxu1 %v339_v10  ;;  %v327_v22 = vld [vmem:[%s970_s6 + $0x158] sm:$0xff]  ;;  %v324_v23 = vld [vmem:[%s970_s6 + $0x140] sm:$0xff]  ;;  %v326_v24 = vld [vmem:[%s970_s6 + $0x150] sm:$0xff] }
  0x48   : > { %v321_v25 = vld [vmem:[%s970_s6 + $0x128] sm:$0xff]  ;;  %v323_v26 = vld [vmem:[%s970_s6 + $0x138] sm:$0xff]  ;;  %v320_v29 = vld [vmem:[%s970_s6 + $0x120] sm:$0xff] }
  0x49   : > { %v281_v27 = vld [vmem:[%s964_s20 + $0x8] sm:$0xff]  ;;  %v283_v28 = vld [vmem:[%s964_s20 + $0x18] sm:$0xff]  ;;  %v322_v30 = vld [vmem:[%s970_s6 + $0x130] sm:$0xff] }
  0x4a   : > { %353 = vmatpush1.xpose.msra.mxu0 %v336_v11  ;;  %423 = vmatpush1.xpose.msra.mxu1 %v338_v12  ;;  %v317_v31 = vld [vmem:[%s970_s6 + $0x108] sm:$0xff]  ;;  %v319_v32 = vld [vmem:[%s970_s6 + $0x118] sm:$0xff]  ;;  %v316_v33 = vld [vmem:[%s970_s6 + $0x100] sm:$0xff] }
  0x4b   : > { %354 = vmatprep.subr.mxu0 %v333_v13  ;;  %424 = vmatprep.subr.mxu1 %v335_v14  ;;  %v318_v34 = vld [vmem:[%s970_s6 + $0x110] sm:$0xff]  ;;  %v313_v35 = vld [vmem:[%s970_s6 + $0xe8] sm:$0xff]  ;;  %v315_v36 = vld [vmem:[%s970_s6 + $0xf8] sm:$0xff] }
  0x4c   : > { %412 = vmatprep.mubr.f32.mxu0 %v281_v27  ;;  %482 = vmatprep.mubr.f32.mxu1 %v283_v28  ;;  %v312_v37 = vld [vmem:[%s970_s6 + $0xe0] sm:$0xff]  ;;  %v314_v38 = vld [vmem:[%s970_s6 + $0xf0] sm:$0xff]  ;;  %v309_v39 = vld [vmem:[%s970_s6 + $0xc8] sm:$0xff] }
  0x4d   : > { %v311_v40 = vld [vmem:[%s970_s6 + $0xd8] sm:$0xff]  ;;  %v308_v41 = vld [vmem:[%s970_s6 + $0xc0] sm:$0xff]  ;;  %v310_v42 = vld [vmem:[%s970_s6 + $0xd0] sm:$0xff] }
  0x4e   : > { %355 = vmatpush1.xpose.msra.mxu0 %v332_v15  ;;  %425 = vmatpush1.xpose.msra.mxu1 %v334_v16  ;;  %v305_v43 = vld [vmem:[%s970_s6 + $0xa8] sm:$0xff]  ;;  %v307_v44 = vld [vmem:[%s970_s6 + $0xb8] sm:$0xff]  ;;  %v304_v45 = vld [vmem:[%s970_s6 + $0xa0] sm:$0xff] }
  0x4f   : > { %356 = vmatprep.subr.mxu0 %v329_v17  ;;  %426 = vmatprep.subr.mxu1 %v331_v18  ;;  %v306_v46 = vld [vmem:[%s970_s6 + $0xb0] sm:$0xff]  ;;  %v301_v47 = vld [vmem:[%s970_s6 + $0x88] sm:$0xff]  ;;  %v303_v48 = vld [vmem:[%s970_s6 + $0x98] sm:$0xff] }
  0x50   : > { %v300_v49 = vld [vmem:[%s970_s6 + $0x80] sm:$0xff]  ;;  %v302_v50 = vld [vmem:[%s970_s6 + $0x90] sm:$0xff]  ;;  %v297_v51 = vld [vmem:[%s970_s6 + $0x68] sm:$0xff] }
  0x51   : > { %v299_v52 = vld [vmem:[%s970_s6 + $0x78] sm:$0xff]  ;;  %v296_v53 = vld [vmem:[%s970_s6 + $0x60] sm:$0xff]  ;;  %v298_v54 = vld [vmem:[%s970_s6 + $0x70] sm:$0xff] }
  0x52   : > { %357 = vmatpush1.xpose.msra.mxu0 %v328_v19  ;;  %427 = vmatpush1.xpose.msra.mxu1 %v330_v20  ;;  %v293_v55 = vld [vmem:[%s970_s6 + $0x48] sm:$0xff]  ;;  %v295_v56 = vld [vmem:[%s970_s6 + $0x58] sm:$0xff]  ;;  %v292_v57 = vld [vmem:[%s970_s6 + $0x40] sm:$0xff] }
  0x53   : > { %358 = vmatprep.subr.mxu0 %v325_v21  ;;  %428 = vmatprep.subr.mxu1 %v327_v22  ;;  %v294_v58 = vld [vmem:[%s970_s6 + $0x50] sm:$0xff]  ;;  %v289_v59 = vld [vmem:[%s970_s6 + $0x28] sm:$0xff]  ;;  %v291_v60 = vld [vmem:[%s970_s6 + $0x38] sm:$0xff] }
  0x54   : > { %v288_v61 = vld [vmem:[%s970_s6 + $0x20] sm:$0xff]  ;;  %v290_v62 = vld [vmem:[%s970_s6 + $0x30] sm:$0xff]  ;;  %v285_v63 = vld [vmem:[%s970_s6 + $0x8] sm:$0xff] }
  0x55   : > { %v287_v0 = vld [vmem:[%s970_s6 + $0x18] sm:$0xff]  ;;  %v284_v1 = vld [vmem:[%s970_s6] sm:$0xff]  ;;  %v286_v2 = vld [vmem:[%s970_s6 + $0x10] sm:$0xff] }
  0x56   : > { %359 = vmatpush1.xpose.msra.mxu0 %v324_v23  ;;  %429 = vmatpush1.xpose.msra.mxu1 %v326_v24  ;;  %v280_v3 = vld [vmem:[%s964_s20] sm:$0xff]  ;;  %v282_v4 = vld [vmem:[%s964_s20 + $0x10] sm:$0xff]  ;;  %v279_v6 = vld [vmem:[#allocation2] sm:$0xff] }
  0x57   : > { %360 = vmatprep.subr.mxu0 %v321_v25  ;;  %430 = vmatprep.subr.mxu1 %v323_v26 }
  0x5a   : > { %361 = vmatpush1.xpose.msra.mxu0 %v320_v29  ;;  %431 = vmatpush1.xpose.msra.mxu1 %v322_v30 }
  0x5b   : > { %362 = vmatprep.subr.mxu0 %v317_v31  ;;  %432 = vmatprep.subr.mxu1 %v319_v32 }
  0x5e   : > { %363 = vmatpush1.xpose.msra.mxu0 %v316_v33  ;;  %433 = vmatpush1.xpose.msra.mxu1 %v318_v34 }
  0x5f   : > { %364 = vmatprep.subr.mxu0 %v313_v35  ;;  %434 = vmatprep.subr.mxu1 %v315_v36 }
  0x62   : > { %365 = vmatpush1.xpose.msra.mxu0 %v312_v37  ;;  %435 = vmatpush1.xpose.msra.mxu1 %v314_v38 }
  0x63   : > { %366 = vmatprep.subr.mxu0 %v309_v39  ;;  %436 = vmatprep.subr.mxu1 %v311_v40 }
  0x66   : > { %367 = vmatpush1.xpose.msra.mxu0 %v308_v41  ;;  %437 = vmatpush1.xpose.msra.mxu1 %v310_v42 }
  0x67   : > { %368 = vmatprep.subr.mxu0 %v305_v43  ;;  %438 = vmatprep.subr.mxu1 %v307_v44 }
  0x6a   : > { %369 = vmatpush1.xpose.msra.mxu0 %v304_v45  ;;  %439 = vmatpush1.xpose.msra.mxu1 %v306_v46 }
  0x6b   : > { %370 = vmatprep.subr.mxu0 %v301_v47  ;;  %440 = vmatprep.subr.mxu1 %v303_v48 }
  0x6e   : > { %371 = vmatpush1.xpose.msra.mxu0 %v300_v49  ;;  %441 = vmatpush1.xpose.msra.mxu1 %v302_v50 }
  0x6f   : > { %372 = vmatprep.subr.mxu0 %v297_v51  ;;  %442 = vmatprep.subr.mxu1 %v299_v52 }
  0x72   : > { %373 = vmatpush1.xpose.msra.mxu0 %v296_v53  ;;  %443 = vmatpush1.xpose.msra.mxu1 %v298_v54 }
  0x73   : > { %374 = vmatprep.subr.mxu0 %v293_v55  ;;  %444 = vmatprep.subr.mxu1 %v295_v56 }
  0x76   : > { %375 = vmatpush1.xpose.msra.mxu0 %v292_v57  ;;  %445 = vmatpush1.xpose.msra.mxu1 %v294_v58 }
  0x77   : > { %376 = vmatprep.subr.mxu0 %v289_v59  ;;  %446 = vmatprep.subr.mxu1 %v291_v60 }
  0x7a   : > { %377 = vmatpush1.xpose.msra.mxu0 %v288_v61  ;;  %447 = vmatpush1.xpose.msra.mxu1 %v290_v62 }
  0x7b   : > { %378 = vmatprep.subr.mxu0 %v285_v63  ;;  %448 = vmatprep.subr.mxu1 %v287_v0 }
  0x7e   : > { %379 = vmatpush1.xpose.msra.mxu0 %v284_v1  ;;  %449 = vmatpush1.xpose.msra.mxu1 %v286_v2 }
  0x81   : > { %413 = vmatmul.mubr.f32.vlgmr.msra.gmra.mxu0 %v280_v3  ;;  %483 = vmatmul.mubr.f32.vlgmr.msra.gmra.mxu1 %v282_v4 }
 0x141   : > { %v414_v5 = vpop.f32.mrf.mxu0  ;;  %v484_v7 = vpop.f32.mrf.mxu1 }
 0x142   : > { %v485_v8 = vadd.f32 %v484_v7, %v414_v5  ;;  %493 = sbr.rel (%p627_p7) target bundleno = 335 (0x14f), region = 48 }
 0x143   : > { %v416_v9 = vpop.f32.mrf.mxu0  ;;  %v486_v10 = vpop.f32.mrf.mxu1 }
 0x144   : > { %v488_v11 = vadd.f32 %v485_v8, %v279_v6 }
 0x146   : > { %489 = vst [vmem:[#allocation2] sm:$0xff] %v488_v11 }
 0x14d   : > { %v494_v12 = vld [vmem:[#allocation2] sm:$0xff] }
 0x14e   : > { %495 = vst [vmem:[#allocation8] sm:$0xff] %v494_v12 }
 0x14f PF: > { %p1051_p10 = scmp.eq.s32.totalorder %s612_s18, 1  ;;  %s849_s29 = smov [#allocation8]  }
 0x150   : > { %s506_s4 = sshll.u32 %s849_s29, 4  ;;  %s507_s4 = int_to_ptr.vmem [resolvable:$true] %s506_s4 }
 0x151   : > { %s760_s9 = scalar_lea.vmem %s507_s4, 128  ;;  %p767_p6 = scmp.lt.s32.totalorder %s507_s4, %s507_s4 }
 0x152   : > { %p761_p3 = scmp.ne.s32.totalorder %s507_s4, %s760_s9  ;;  %p768_p8 = scmp.lt.s32.totalorder %s760_s9, %s760_s9 }
 0x154   : > { %p762_p4 = pnand %p761_p3, %p1051_p10  ;;  %p769_p11 = por %p768_p8, %p767_p6 }
 0x156   : > { %p763_p5 = pneg %p762_p4 }
 0x158   : > { %p770_p12 = pnand %p769_p11, %p763_p5 }
 0x15a   : > { %773 = shalt.err (!%p770_p12)
}
 0x15b   : > { %639 = dma.vmem_to_hbm [thread:$0]  (%p1051_p10), %s507_s4, 128, %s1087_s3, [#allocation5]  }
 0x15c   : > { %817 = dma.done.wait (%p1051_p10), [#allocation5], 128  }
 0x15d   : > { %819 = vsyncadd (%p1051_p10), [#allocation5], 4294967168 }
 0x15e PF: > { %s20_s17 = sadd.s32 1, %s842_s17   ;;  %s1093_s12 = smov %s826_s13 }
 0x15f   : > { %p17_p13 = scmp.ge.s32.totalorder %s20_s17, 4   ;;  %s1094_s13 = smov %s830_s14 }
 0x160   : > { %s1095_s14 = smov %s921_s24  ;;  %s1096_s15 = smov %s838_s16 }
 0x161   : > { %s1097_s16 = smov %s1099_s19  ;;  %19 = sbr.rel (!%p17_p13) target bundleno = 7 (0x7), region = 94 }
 0x166   :  { %519 = vsyncpa [#allocation4], 1 }
 0x167   :  { %521 = vsyncpa [#allocation4 + $0x1], 1 }
 0x168   :  { %522 = vsyncpa [#allocation7], 1 }
 0x169   :  { %524 = vsyncpa [#allocation7 + $0x1], 1 }
 0x16a   :  { %525 = vsyncpa [#allocation5], 1 }
 0x16b   :  { %527 = vsyncpa [#allocation5 + $0x1], 1 }

</bundles_post_ra>
